<compile_context>
chip_gen: v7x
topology: tpu7x:2x2x1
jax: 0.10.0
libtpu: 0.0.40
codegen_flags: <defaults>
</compile_context>

<pallas_src>
import functools

import jax
import jax.numpy as jnp
from jax.experimental import pallas as pl
from jax.experimental.pallas import tpu as pltpu


# ----------------------------------------------------------------------------
# Kernels
# ----------------------------------------------------------------------------
def _generator_kernel(z_ref, c_ref, w1z_ref, w1c_ref, b1_ref, w2_ref, b2_ref,
                      out_ref):
    """fc1(concat fused) -> LeakyReLU(0.2) -> fc3 -> Sigmoid on one batch tile."""
    zb = z_ref[...].astype(jnp.bfloat16)
    cb = c_ref[...].astype(jnp.bfloat16)
    # concat(z, c) @ W1  ==  z @ W1[:Lz] + c @ W1[Lz:]
    h = (jnp.dot(zb, w1z_ref[...], preferred_element_type=jnp.float32)
         + jnp.dot(cb, w1c_ref[...], preferred_element_type=jnp.float32)
         + b1_ref[...])
    x1 = jnp.maximum(h, 0.2 * h)                          # LeakyReLU(0.2), f32 VPU
    y = jnp.dot(x1.astype(jnp.bfloat16), w2_ref[...],
                preferred_element_type=jnp.float32) + b2_ref[...]
    e = jnp.exp(-y)                                       # EUP
    out_ref[...] = pl.reciprocal(1.0 + e, approx=True).astype(out_ref.dtype)


def _generator_feedback_kernel(z_ref, c_ref, w1z_ref, w1c_ref, b1_ref, w2_ref,
                               b2_ref, a1_ref, fb_ref, out_ref):
    """Same as above with `x1 + a1 * feedback_layers` before fc3."""
    zb = z_ref[...].astype(jnp.bfloat16)
    cb = c_ref[...].astype(jnp.bfloat16)
    h = (jnp.dot(zb, w1z_ref[...], preferred_element_type=jnp.float32)
         + jnp.dot(cb, w1c_ref[...], preferred_element_type=jnp.float32)
         + b1_ref[...])
    x1 = jnp.maximum(h, 0.2 * h)
    x1 = x1 + a1_ref[...] * fb_ref[...]                   # f32 VPU FMA
    y = jnp.dot(x1.astype(jnp.bfloat16), w2_ref[...],
                preferred_element_type=jnp.float32) + b2_ref[...]
    e = jnp.exp(-y)
    out_ref[...] = pl.reciprocal(1.0 + e, approx=True).astype(out_ref.dtype)


# ----------------------------------------------------------------------------
# Wrapper
# ----------------------------------------------------------------------------
def _round_up(x, m):
    return ((x + m - 1) // m) * m


def _resident_spec(shape):
    # Full-array block, re-used (VMEM-resident) across all batch-grid steps.
    return pl.BlockSpec(shape, lambda i: tuple(0 for _ in shape))


def _batch_spec(tb, feat):
    # Batch-tiled activation block: (tb, feat) window marching down the rows.
    return pl.BlockSpec((tb, feat), lambda i: (i, 0))


@functools.partial(jax.jit, static_argnames=("use_feedback",))
def generator_forward(z, c, w1, b1, w2, b2, a1=None, feedback_layers=None,
                      use_feedback=False):
    """JAX wrapper mirroring Generator.forward.

    z: (B, latent_size)    c: (B, dim_bias)
    w1: (latent+bias, H0)  b1: (1, H0)
    w2: (H0, H1)           b2: (1, H1)
    a1 / feedback_layers: (B, H0) when use_feedback.
    Returns sigmoid output of shape (B, H1), float32.
    """
    B, Lz = z.shape
    Lc = c.shape[1]
    H0 = w1.shape[1]
    H1 = w2.shape[1]

    # bf16 MXU operands (accumulation stays f32 inside the kernel); biases f32.
    w1 = w1.astype(jnp.bfloat16)
    w2 = w2.astype(jnp.bfloat16)
    b1 = b1.astype(jnp.float32)
    b2 = b2.astype(jnp.float32)
    # concat fused into the kernel by splitting W1 along its input dim.
    w1z = w1[:Lz, :]
    w1c = w1[Lz:, :]

    # Batch tiling: multiple of 8 sublanes; sized well under v7x's 64 MiB VMEM
    # (per-step f32 activation tiles are only ~TB * (Lz+Lc+H0+H1) * 4 bytes).
    TB = min(512, _round_up(B, 8))
    padded_B = _round_up(B, TB)
    if padded_B != B:
        pad = padded_B - B
        z = jnp.pad(z, ((0, pad), (0, 0)))
        c = jnp.pad(c, ((0, pad), (0, 0)))
        if use_feedback:
            a1 = jnp.pad(a1, ((0, pad), (0, 0)))
            feedback_layers = jnp.pad(feedback_layers, ((0, pad), (0, 0)))
    grid = (padded_B // TB,)

    out_shape = jax.ShapeDtypeStruct((padded_B, H1), jnp.float32)

    flops = 2 * padded_B * (Lz * H0 + Lc * H0 + H0 * H1)
    bytes_accessed = (
        z.size * z.dtype.itemsize + c.size * c.dtype.itemsize
        + w1.size * 2 + w2.size * 2 + b1.size * 4 + b2.size * 4
        + padded_B * H1 * 4
        + (2 * padded_B * H0 * 4 if use_feedback else 0))
    cost = pl.CostEstimate(flops=flops, transcendentals=padded_B * H1,
                           bytes_accessed=bytes_accessed)

    compiler_params = pltpu.CompilerParams(dimension_semantics=("parallel",))

    in_specs = [
        _batch_spec(TB, Lz),            # z
        _batch_spec(TB, Lc),            # c
        _resident_spec(w1z.shape),      # W1[:Lz]
        _resident_spec(w1c.shape),      # W1[Lz:]
        _resident_spec(b1.shape),       # b1
        _resident_spec(w2.shape),       # W2
        _resident_spec(b2.shape),       # b2
    ]
    out_specs = _batch_spec(TB, H1)

    if not use_feedback:
        out = pl.pallas_call(
            _generator_kernel,
            out_shape=out_shape,
            grid=grid,
            in_specs=in_specs,
            out_specs=out_specs,
            compiler_params=compiler_params,
            cost_estimate=cost,
        )(z, c, w1z, w1c, b1, w2, b2)
    else:
        out = pl.pallas_call(
            _generator_feedback_kernel,
            out_shape=out_shape,
            grid=grid,
            in_specs=in_specs + [_batch_spec(TB, H0),    # a1
                                 _batch_spec(TB, H0)],   # feedback_layers
            out_specs=out_specs,
            compiler_params=compiler_params,
            cost_estimate=cost,
        )(z, c, w1z, w1c, b1, w2, b2, a1, feedback_layers)

    if padded_B != B:
        out = out[:B]
    return out


# ----------------------------------------------------------------------------
# Deterministic parameter init (mirrors weights_init: N(0, 0.02) weights, 0 bias)
# ----------------------------------------------------------------------------
def init_generator_params(key, latent_size, dim_bias, layer_sizes):
    input_size = latent_size + dim_bias
    h0, h1 = layer_sizes
    k1, k2 = jax.random.split(key)
    w1 = 0.02 * jax.random.normal(k1, (input_size, h0), dtype=jnp.float32)
    b1 = jnp.zeros((1, h0), dtype=jnp.float32)
    w2 = 0.02 * jax.random.normal(k2, (h0, h1), dtype=jnp.float32)
    b2 = jnp.zeros((1, h1), dtype=jnp.float32)
    return w1, b1, w2, b2


# ----------------------------------------------------------------------------
# Reference (pure JAX, f32) for sanity checking
# ----------------------------------------------------------------------------
def reference_forward(z, c, w1, b1, w2, b2, a1=None, fb=None, use_feedback=False):
    zc = jnp.concatenate([z, c], axis=-1)
    h = zc @ w1 + b1
    x1 = jnp.where(h > 0, h, 0.2 * h)
    if use_feedback:
        x1 = x1 + a1 * fb
    return jax.nn.sigmoid(x1 @ w2 + b2)


if __name__ == "__main__":
    # Shapes implied by the module: latent_size=16, dim_bias=16,
    # decoder_layer_sizes=[64, 128], batch=8.
    latent_size, dim_bias = 16, 16
    layer_sizes = (64, 128)
    batch = 8

    key = jax.random.PRNGKey(0)
    kp, kz, kc, ka, kf = jax.random.split(key, 5)

    w1, b1, w2, b2 = init_generator_params(kp, latent_size, dim_bias, layer_sizes)

    z = jax.random.normal(kz, (batch, latent_size), dtype=jnp.float32)
    c = jax.random.normal(kc, (batch, dim_bias), dtype=jnp.float32)
    a1 = jax.random.normal(ka, (batch, layer_sizes[0]), dtype=jnp.float32)
    fb = jax.random.normal(kf, (batch, layer_sizes[0]), dtype=jnp.float32)

    # Path 1: no feedback (Generator._forward)
    out = generator_forward(z, c, w1, b1, w2, b2, use_feedback=False)
    out = jax.block_until_ready(out)
    ref = reference_forward(z, c, w1, b1, w2, b2)
    assert out.shape == (batch, layer_sizes[1])
    # bf16 MXU operands + approx reciprocal -> loosened tolerance vs f32 reference.
    assert jnp.allclose(out, ref, atol=2e-2, rtol=2e-2), float(jnp.max(jnp.abs(out - ref)))

    # Path 2: feedback branch of Generator.forward
    out_fb = generator_forward(z, c, w1, b1, w2, b2, a1, fb, use_feedback=True)
    out_fb = jax.block_until_ready(out_fb)
    ref_fb = reference_forward(z, c, w1, b1, w2, b2, a1, fb, use_feedback=True)
    assert jnp.allclose(out_fb, ref_fb, atol=2e-2, rtol=2e-2), \
        float(jnp.max(jnp.abs(out_fb - ref_fb)))

    print("KERNEL_OK")
</pallas_src>

<mosaic_0001>
module attributes {stable_mosaic.version = 11 : i64} {
  func.func @_generator_kernel(%arg0: i32, %arg1: memref<8x16xf32, #tpu.memory_space<vmem>>, %arg2: memref<8x16xf32, #tpu.memory_space<vmem>>, %arg3: memref<16x64xbf16, #tpu.memory_space<vmem>>, %arg4: memref<16x64xbf16, #tpu.memory_space<vmem>>, %arg5: memref<1x64xf32, #tpu.memory_space<vmem>>, %arg6: memref<64x128xbf16, #tpu.memory_space<vmem>>, %arg7: memref<1x128xf32, #tpu.memory_space<vmem>>, %arg8: memref<8x128xf32, #tpu.memory_space<vmem>>) attributes {dimension_semantics = [#tpu.dimension_semantics<parallel>], iteration_bounds = array<i64: 1>, scalar_prefetch = 0 : i64, scratch_operands = 0 : i64, tpu.core_type = #tpu.core_type<tc>, window_params = [{transform_indices = @transform_0, window_bounds = array<i64: 8, 16>}, {transform_indices = @transform_1, window_bounds = array<i64: 8, 16>}, {pipeline_mode = #tpu.pipeline_mode<synchronous>, transform_indices = @transform_2, window_bounds = array<i64: 16, 64>}, {pipeline_mode = #tpu.pipeline_mode<synchronous>, transform_indices = @transform_3, window_bounds = array<i64: 16, 64>}, {pipeline_mode = #tpu.pipeline_mode<synchronous>, transform_indices = @transform_4, window_bounds = array<i64: 1, 64>}, {pipeline_mode = #tpu.pipeline_mode<synchronous>, transform_indices = @transform_5, window_bounds = array<i64: 64, 128>}, {pipeline_mode = #tpu.pipeline_mode<synchronous>, transform_indices = @transform_6, window_bounds = array<i64: 1, 128>}, {transform_indices = @transform_7, window_bounds = array<i64: 8, 128>}]} {
    %c0 = arith.constant 0 : index
    %c0_0 = arith.constant 0 : index
    %0 = vector.load %arg1[%c0, %c0_0] : memref<8x16xf32, #tpu.memory_space<vmem>>, vector<8x16xf32>
    %1 = arith.truncf %0 : vector<8x16xf32> to vector<8x16xbf16>
    %c0_1 = arith.constant 0 : index
    %c0_2 = arith.constant 0 : index
    %2 = vector.load %arg2[%c0_1, %c0_2] : memref<8x16xf32, #tpu.memory_space<vmem>>, vector<8x16xf32>
    %3 = arith.truncf %2 : vector<8x16xf32> to vector<8x16xbf16>
    %c0_3 = arith.constant 0 : index
    %c0_4 = arith.constant 0 : index
    %4 = vector.load %arg3[%c0_3, %c0_4] : memref<16x64xbf16, #tpu.memory_space<vmem>>, vector<16x64xbf16>
    %cst = arith.constant dense<0.000000e+00> : vector<8x64xf32>
    %5 = tpu.matmul %1, %4, %cst {dimension_numbers = #tpu.dot_dimension_numbers<[1], [0], [0], [1], [0, 0, 1, 1], [], []>} : vector<8x16xbf16>, vector<16x64xbf16>, vector<8x64xf32> -> vector<8x64xf32>
    %c0_5 = arith.constant 0 : index
    %c0_6 = arith.constant 0 : index
    %6 = vector.load %arg4[%c0_5, %c0_6] : memref<16x64xbf16, #tpu.memory_space<vmem>>, vector<16x64xbf16>
    %cst_7 = arith.constant dense<0.000000e+00> : vector<8x64xf32>
    %7 = tpu.matmul %3, %6, %cst_7 {dimension_numbers = #tpu.dot_dimension_numbers<[1], [0], [0], [1], [0, 0, 1, 1], [], []>} : vector<8x16xbf16>, vector<16x64xbf16>, vector<8x64xf32> -> vector<8x64xf32>
    %8 = arith.addf %5, %7 : vector<8x64xf32>
    %c0_8 = arith.constant 0 : index
    %c0_9 = arith.constant 0 : index
    %9 = vector.load %arg5[%c0_8, %c0_9] : memref<1x64xf32, #tpu.memory_space<vmem>>, vector<1x64xf32>
    %10 = vector.broadcast %9 : vector<1x64xf32> to vector<8x64xf32>
    %11 = arith.addf %8, %10 : vector<8x64xf32>
    %cst_10 = arith.constant 2.000000e-01 : f32
    %12 = vector.broadcast %cst_10 : f32 to vector<8x64xf32>
    %13 = arith.mulf %12, %11 : vector<8x64xf32>
    %14 = arith.maximumf %11, %13 : vector<8x64xf32>
    %15 = arith.truncf %14 : vector<8x64xf32> to vector<8x64xbf16>
    %c0_11 = arith.constant 0 : index
    %c0_12 = arith.constant 0 : index
    %16 = vector.load %arg6[%c0_11, %c0_12] : memref<64x128xbf16, #tpu.memory_space<vmem>>, vector<64x128xbf16>
    %cst_13 = arith.constant dense<0.000000e+00> : vector<8x128xf32>
    %17 = tpu.matmul %15, %16, %cst_13 {dimension_numbers = #tpu.dot_dimension_numbers<[1], [0], [0], [1], [0, 0, 1, 1], [], []>} : vector<8x64xbf16>, vector<64x128xbf16>, vector<8x128xf32> -> vector<8x128xf32>
    %c0_14 = arith.constant 0 : index
    %c0_15 = arith.constant 0 : index
    %18 = vector.load %arg7[%c0_14, %c0_15] : memref<1x128xf32, #tpu.memory_space<vmem>>, vector<1x128xf32>
    %19 = vector.broadcast %18 : vector<1x128xf32> to vector<8x128xf32>
    %20 = arith.addf %17, %19 : vector<8x128xf32>
    %cst_16 = arith.constant 0.000000e+00 : f32
    %21 = vector.broadcast %cst_16 : f32 to vector<8x128xf32>
    %22 = arith.subf %21, %20 : vector<8x128xf32>
    %23 = math.exp %22 : vector<8x128xf32>
    %cst_17 = arith.constant 1.000000e+00 : f32
    %24 = vector.broadcast %cst_17 : f32 to vector<8x128xf32>
    %25 = arith.addf %24, %23 : vector<8x128xf32>
    %26 = tpu.reciprocal %25 {approx = true} : vector<8x128xf32> -> vector<8x128xf32>
    %c0_18 = arith.constant 0 : index
    %c0_19 = arith.constant 0 : index
    %27 = vector.load %arg8[%c0_18, %c0_19] : memref<8x128xf32, #tpu.memory_space<vmem>>, vector<8x128xf32>
    tpu.vector_store %arg8[%c0_18, %c0_19], %26 {strides = array<i32>} : memref<8x128xf32, #tpu.memory_space<vmem>>, vector<8x128xf32>,
    return
  }
  func.func @transform_0(%arg0: i32) -> (i32, i32) {
    %c0_i32 = arith.constant 0 : i32
    %c0_i32_0 = arith.constant 0 : i32
    return %arg0, %c0_i32 : i32, i32
  }
  func.func @transform_1(%arg0: i32) -> (i32, i32) {
    %c0_i32 = arith.constant 0 : i32
    %c0_i32_0 = arith.constant 0 : i32
    return %arg0, %c0_i32 : i32, i32
  }
  func.func @transform_2(%arg0: i32) -> (i32, i32) {
    %c0_i32 = arith.constant 0 : i32
    %c0_i32_0 = arith.constant 0 : i32
    %c0_i32_1 = arith.constant 0 : i32
    return %c0_i32, %c0_i32_0 : i32, i32
  }
  func.func @transform_3(%arg0: i32) -> (i32, i32) {
    %c0_i32 = arith.constant 0 : i32
    %c0_i32_0 = arith.constant 0 : i32
    %c0_i32_1 = arith.constant 0 : i32
    return %c0_i32, %c0_i32_0 : i32, i32
  }
  func.func @transform_4(%arg0: i32) -> (i32, i32) {
    %c0_i32 = arith.constant 0 : i32
    %c0_i32_0 = arith.constant 0 : i32
    %c0_i32_1 = arith.constant 0 : i32
    return %c0_i32, %c0_i32_0 : i32, i32
  }
  func.func @transform_5(%arg0: i32) -> (i32, i32) {
    %c0_i32 = arith.constant 0 : i32
    %c0_i32_0 = arith.constant 0 : i32
    %c0_i32_1 = arith.constant 0 : i32
    return %c0_i32, %c0_i32_0 : i32, i32
  }
  func.func @transform_6(%arg0: i32) -> (i32, i32) {
    %c0_i32 = arith.constant 0 : i32
    %c0_i32_0 = arith.constant 0 : i32
    %c0_i32_1 = arith.constant 0 : i32
    return %c0_i32, %c0_i32_0 : i32, i32
  }
  func.func @transform_7(%arg0: i32) -> (i32, i32) {
    %c0_i32 = arith.constant 0 : i32
    %c0_i32_0 = arith.constant 0 : i32
    return %arg0, %c0_i32 : i32, i32
  }
}

</mosaic_0001>

<bundles_post_ra>
// kernel: generator_forward.1
= control target key start
LH: loop header
LB: loop body
LE: loop exit
PB: predicated region body
PF: predicated region fallthrough
CT: control target
= control target key end

     0   :  { %v330_v1 = vmov 0.0   ;;  %vm331_vm0 = vmmov 0   ;;  %vm42_vm1 = vcmask 130048   ;;  %s415_s0 = inlined_call_operand.vmem [shape: f32[8,16], index: 0, kind: input, shape index: {}]   ;;  %s416_s1 = inlined_call_operand.vmem [shape: f32[8,16], index: 1, kind: input, shape index: {}]   ;;  %s417_s2 = inlined_call_operand.vmem [shape: bf16[16,64], index: 2, kind: input, shape index: {}]   ;;  %s418_s3 = inlined_call_operand.vmem [shape: bf16[16,64], index: 3, kind: input, shape index: {}]   ;;  %s419_s4 = inlined_call_operand.vmem [shape: f32[1,64], index: 4, kind: input, shape index: {}]   ;;  %s420_s5 = inlined_call_operand.vmem [shape: bf16[64,128], index: 5, kind: input, shape index: {}]   ;;  %s421_s6 = inlined_call_operand.vmem [shape: f32[1,128], index: 6, kind: input, shape index: {}]   ;;  %s422_s7 = inlined_call_operand.hbm [shape: f32[8,128], index: 7, kind: output, shape index: {}]  }
   0x1   :  { %v296_v0 = vld [vmem:[%s418_s3] sm:$0xff]   ;;  %269 = vmatprep.subr.bf16.mxu1 %v330_v1  ;;  %281 = vmatprep.subr.bf16.mxu0 %v330_v1 }
   0x2   :  { %v30_v2 = vld [vmem:[%s416_s1] sm:$0xff]  ;;  %270 = vmatpush3.bf16.msra.mxu1 %v296_v0  ;;  %271 = vmatprep.mubr.msk.bf16.mxu1 %vm331_vm0, %v330_v1 }
   0x3   :  { %v31_v3 = vpack.c.bf16 %v30_v2, %v30_v2  ;;  %v297_v4 = vld [vmem:[%s417_s2] sm:$0xff]   ;;  %275 = vmatprep.subr.bf16.mxu1 %v330_v1  ;;  %289 = vmatprep.mubr.msk.bf16.mxu0 %vm331_vm0, %v330_v1 }
   0x5   :  { %272 = vmatmul.mubr.msk.bf16.vlgmr.msra.gmra.mrb[0].mxu1 %vm42_vm1, %v31_v3 }
   0x6   :  { %12 = vsyncpa [#allocation3], 0  ;;  %276 = vmatpush3.bf16.msra.mxu1 %v297_v4  ;;  %277 = vmatprep.mubr.msk.bf16.mxu1 %vm331_vm0, %v330_v1  ;;  %v28_v5 = vld [vmem:[%s415_s0] sm:$0xff]  ;;  %v299_v8 = vld [vmem:[%s420_s5 + $0x8] sm:$0xff]   ;;  %vm185_vm2 = vcmask 523264  }
   0x7   :  { %v29_v6 = vpack.c.bf16 %v28_v5, %v28_v5  ;;  %v298_v7 = vld [vmem:[%s420_s5] sm:$0xff]   ;;  %v300_v9 = vld [vmem:[%s420_s5 + $0x10] sm:$0xff]   ;;  %v301_v10 = vld [vmem:[%s420_s5 + $0x18] sm:$0xff]  }
   0x8   :  { %282 = vmatpush3.bf16.msra.mxu0 %v298_v7  ;;  %v253_v16 = vld [vmem:[%s419_s4] ss:$0 sm:$0xff]  ;;  %s332_s4 = smov [#allocation2]  }
   0x9   :  { %283 = vmatprep.subr.bf16.mxu0 %v330_v1  ;;  %v254_v25 = vld [vmem:[%s421_s6] ss:$0 sm:$0xff]  ;;  %s241_s16 = sshll.u32 %s332_s4, 4  ;;  %s242_s16 = int_to_ptr.vmem [resolvable:$true] %s241_s16 }
   0xa   :  { %s306_s17 = scalar_lea.vmem %s242_s16, 128  ;;  %p311_p1 = scmp.lt.s32.totalorder %s242_s16, %s242_s16 }
   0xb   :  { %p307_p0 = scmp.ne.s32.totalorder %s242_s16, %s306_s17  ;;  %p312_p2 = scmp.lt.s32.totalorder %s306_s17, %s306_s17 }
   0xc   :  { %284 = vmatpush3.bf16.msra.mxu0 %v299_v8 }
   0xd   :  { %278 = vmatmul.mubr.msk.bf16.vlgmr.msra.gmra.mrb[4].mxu1 %vm42_vm1, %v29_v6  ;;  %285 = vmatprep.subr.bf16.mxu0 %v330_v1  ;;  %p313_p3 = por %p312_p2, %p311_p1 }
   0xf   :  { %p314_p4 = pnand %p313_p3, %p307_p0 }
  0x10   :  { %286 = vmatpush3.bf16.msra.mxu0 %v300_v9 }
  0x11   :  { %287 = vmatprep.subr.bf16.mxu0 %v330_v1 }
  0x14   :  { %288 = vmatpush3.bf16.msra.mxu0 %v301_v10 }
  0xd8   :  { %v80_v11 = vpop.f32.mrb[0].mxu1 }
  0xd9   :  { %v273_v12 = vpop.f32.mrb[1].mxu1 }
  0xda   :  { %v83_v13 = vpop.f32.mrb[2].mxu1 }
  0xdb   :  { %v274_v14 = vpop.f32.mrb[3].mxu1 }
  0xe0   :  { %v129_v15 = vpop.f32.mrb[4].mxu1 }
  0xe1   :  { %v130_v17 = vadd.f32 %v129_v15, %v80_v11  ;;  %v279_v18 = vpop.f32.mrb[5].mxu1 }
  0xe2   :  { %v132_v19 = vpop.f32.mrb[6].mxu1 }
  0xe3   :  { %v142_v20 = vadd.f32 %v253_v16, %v130_v17  ;;  %v280_v21 = vpop.f32.mrb[7].mxu1 }
  0xe5   :  { %v143_v22 = vmul.f32 0.2, %v142_v20 }
  0xe7   :  { %v144_v23 = vmax.f32 %v142_v20, %v143_v22 }
  0xe9   :  { %v145_v24 = vpack.c.bf16 %v144_v23, %v144_v23 }
  0xeb   :  { %290 = vmatmul.mubr.msk.bf16.vlgmr.msra.gmra.mrb[0].mxu0 %vm185_vm2, %v145_v24 }
 0x1be   :  { %v223_v26 = vpop.f32.mrb[0].mxu0 }
 0x1bf   :  { %v224_v27 = vadd.f32 %v254_v25, %v223_v26  ;;  %v291_v28 = vpop.f32.mrb[1].mxu0 }
 0x1c0   :  { %v226_v29 = vpop.f32.mrb[2].mxu0 }
 0x1c1   :  { %v229_v30 = vsub.f32 0.0, %v224_v27  ;;  %v292_v31 = vpop.f32.mrb[3].mxu0 }
 0x1c3   :  { %v230_v32 = vmul.f32 1.442695, %v229_v30 }
 0x1c5   :  { %302 = vpow2.f32 %v230_v32 }
 0x1cf   :  { %v303_v33 = vpop.eup %302 }
 0x1d0   :  { %v232_v34 = vadd.f32 1.0, %v303_v33 }
 0x1d2   :  { %304 = vrcp.f32 %v232_v34 }
 0x1dc   :  { %v305_v35 = vpop.eup %304 }
 0x1dd   :  { %234 = vst [vmem:[#allocation2] sm:$0xff] %v305_v35 }
 0x1de   :  { %317 = shalt.err (!%p314_p4)
}
 0x1df   :  { %s318_s19 = scalar_lea.hbm %s422_s7, 128 }
 0x1e0   :  { %p319_p5 = scmp.ne.s32.totalorder %s422_s7, %s318_s19  ;;  %p322_p6 = scmp.lt.u32.totalorder %s318_s19, %s422_s7 }
 0x1e2   :  { %p324_p7 = pnand %p322_p6, %p319_p5 }
 0x1e4   :  { %327 = shalt.err (!%p324_p7)
}
 0x1e5   :  { %244 = dma.vmem_to_hbm [thread:$0]  %s242_s16, 128, %s422_s7, [#allocation3]  }
 0x1e6   :  { %328 = dma.done.wait [#allocation3], 128  }
 0x1e7   :  { %329 = vsyncadd [#allocation3], 4294967168 }
 0x1e8   :  { %248 = vsyncpa [#allocation3], 1 }

</bundles_post_ra>
